<compile_context>
chip_gen: v7x
topology: tpu7x:2x2x1
jax: 0.10.0
libtpu: 0.0.40
codegen_flags: <defaults>
</compile_context>

<pallas_src>
import functools

import jax
import jax.numpy as jnp
from jax.experimental import pallas as pl
from jax.experimental.pallas import tpu as pltpu


def _round_up(x, m):
    return ((x + m - 1) // m) * m


def mlp_kernel(x_ref, w1_ref, b1_ref, w2_ref, b2_ref, w3_ref, b3_ref, o_ref):
    # x_ref: [3, T]   (feature-major, batch on the 128-lane axis)
    # w1_ref: [32, 3], b1_ref: [32, 1]
    # w2_ref: [16, 32], b2_ref: [16, 1]
    # w3_ref: [3, 16],  b3_ref: [3, 1]
    x = x_ref[...]

    # ---- Layer 1: Linear(3, 32) + ReLU  (MXU, f32 accumulate) ---------------
    h1 = jnp.dot(w1_ref[...], x, preferred_element_type=jnp.float32) + b1_ref[...]
    h1 = jnp.maximum(h1, 0.0)                         # [32, T]

    # ---- Layer 2: Linear(32, 16) + ReLU (MXU) --------------------------------
    h2 = jnp.dot(w2_ref[...], h1, preferred_element_type=jnp.float32) + b2_ref[...]
    h2 = jnp.maximum(h2, 0.0)                         # [16, T]

    # ---- Layer 3: Linear(16, 3) (MXU) ----------------------------------------
    out = jnp.dot(w3_ref[...], h2, preferred_element_type=jnp.float32) + b3_ref[...]

    o_ref[...] = out.astype(o_ref.dtype)


def _prep_params(params):
    w1, b1, w2, b2, w3, b3 = params
    return (w1.astype(jnp.float32), b1.reshape(32, 1).astype(jnp.float32),
            w2.astype(jnp.float32), b2.reshape(16, 1).astype(jnp.float32),
            w3.astype(jnp.float32), b3.reshape(3, 1).astype(jnp.float32))


def multiclass_risk_forward_fm(x_t, params, *, tile_b=32768):
    """Feature-major Pallas forward pass (no wrapper relayouts).

    x_t: [3, B] float.  Returns [3, B] float32.
    """
    w1, b1c, w2, b2c, w3, b3c = _prep_params(params)
    B = x_t.shape[1]

    # Lane-aligned batch tile (multiple of 128), no bigger than needed, capped at 64K rows.
    tile_b = min(tile_b, 65536)
    tile_b = min(_round_up(max(tile_b, 128), 128), _round_up(max(B, 1), 128))
    b_pad = _round_up(max(B, 1), tile_b)
    num_tiles = b_pad // tile_b

    if b_pad != B:
        x_t = jnp.pad(x_t.astype(jnp.float32), ((0, 0), (0, b_pad - B)))
    else:
        x_t = x_t.astype(jnp.float32)

    const = lambda i: (0, 0)          # weights/biases stay VMEM-resident across the grid
    batch_map = lambda i: (0, i)

    # ~240 B/row of VMEM (double-buffered in/out + h1/h2 temps) plus slack.
    vmem_bytes = int(2 * 2 * 3 * tile_b * 4 + (32 + 16) * tile_b * 4 + (2 << 20))
    vmem_limit = min(max(vmem_bytes, 8 << 20), 48 << 20)

    flops_per_row = 2 * (3 * 32 + 32 * 16 + 16 * 3)   # 1312
    cost = pl.CostEstimate(
        flops=flops_per_row * b_pad,
        transcendentals=0,
        bytes_accessed=(3 + 3) * b_pad * 4 + (32 * 3 + 32 + 16 * 32 + 16 + 3 * 16 + 3) * 4,
    )

    out_t = pl.pallas_call(
        mlp_kernel,
        out_shape=jax.ShapeDtypeStruct((3, b_pad), jnp.float32),
        grid=(num_tiles,),
        in_specs=[
            pl.BlockSpec((3, tile_b), batch_map),     # x (streamed)
            pl.BlockSpec((32, 3), const),             # W1
            pl.BlockSpec((32, 1), const),             # b1
            pl.BlockSpec((16, 32), const),            # W2
            pl.BlockSpec((16, 1), const),             # b2
            pl.BlockSpec((3, 16), const),             # W3
            pl.BlockSpec((3, 1), const),              # b3
        ],
        out_specs=pl.BlockSpec((3, tile_b), batch_map),
        compiler_params=pltpu.CompilerParams(
            dimension_semantics=("parallel",),        # batch grid can split across v7x's 2 TCs
            vmem_limit_bytes=vmem_limit,
        ),
        cost_estimate=cost,
    )(x_t, w1, b1c, w2, b2c, w3, b3c)

    return out_t[:, :B]


def multiclass_risk_forward(x, params, *, tile_b=32768):
    """Row-major (PyTorch-layout) wrapper. x: [B, 3] float. Returns [B, 3] float32.

    Prefer multiclass_risk_forward_fm with a [3, B] input to avoid the boundary
    transposes (each is an extra HBM read+write pass).
    """
    out_t = multiclass_risk_forward_fm(x.astype(jnp.float32).T, params, tile_b=tile_b)
    return out_t.T


def reference_forward(x, params):
    """Plain-XLA reference matching PyTorch semantics (x @ W.T + b)."""
    w1, b1, w2, b2, w3, b3 = params
    h1 = jnp.maximum(x @ w1.T + b1, 0.0)
    h2 = jnp.maximum(h1 @ w2.T + b2, 0.0)
    return h2 @ w3.T + b3


def risk_forward(x, params, *, min_pallas_batch=4096, tile_b=32768):
    """Dispatcher: for tiny batches the fixed pallas_call launch/DMA overhead dwarfs
    the ~1.3 kFLOPs/row, so fall back to the fused XLA path."""
    if x.shape[0] < min_pallas_batch:
        return reference_forward(x, params)
    return multiclass_risk_forward(x, params, tile_b=tile_b)


def init_params(key):
    """PyTorch-style nn.Linear params: W is [out, in], b is [out]."""
    keys = jax.random.split(key, 6)

    def linear_init(kw, kb, fan_in, fan_out):
        bound = 1.0 / jnp.sqrt(fan_in)
        w = jax.random.uniform(kw, (fan_out, fan_in), jnp.float32, -bound, bound)
        b = jax.random.uniform(kb, (fan_out,), jnp.float32, -bound, bound)
        return w, b

    w1, b1 = linear_init(keys[0], keys[1], 3, 32)
    w2, b2 = linear_init(keys[2], keys[3], 32, 16)
    w3, b3 = linear_init(keys[4], keys[5], 16, 3)
    return (w1, b1, w2, b2, w3, b3)


if __name__ == "__main__":
    key = jax.random.PRNGKey(0)
    k_params, k_x1, k_x2 = jax.random.split(key, 3)
    params = init_params(k_params)

    # Small batch (pads to one 128-row tile).
    x_small = jax.random.normal(k_x1, (8, 3), jnp.float32)
    out_small = jax.block_until_ready(multiclass_risk_forward(x_small, params))
    ref_small = reference_forward(x_small, params)
    assert out_small.shape == (8, 3)
    assert jnp.allclose(out_small, ref_small, atol=2e-3, rtol=2e-3), \
        "Pallas output mismatch vs reference (small batch)"

    # Non-multiple batch with several grid steps (exercises padding + pipelining),
    # via the feature-major entry point (no wrapper transposes).
    x_big = jax.random.normal(k_x2, (300, 3), jnp.float32)
    out_big_t = jax.block_until_ready(
        multiclass_risk_forward_fm(x_big.T, params, tile_b=128))
    ref_big = reference_forward(x_big, params)
    assert out_big_t.shape == (3, 300)
    assert jnp.allclose(out_big_t.T, ref_big, atol=2e-3, rtol=2e-3), \
        "Pallas output mismatch vs reference (gridded batch)"

    print("KERNEL_OK")
</pallas_src>

<mosaic_0001>
module attributes {stable_mosaic.version = 11 : i64} {
  func.func @mlp_kernel(%arg0: i32, %arg1: memref<3x128xf32, #tpu.memory_space<vmem>>, %arg2: memref<32x3xf32, #tpu.memory_space<vmem>>, %arg3: memref<32x1xf32, #tpu.memory_space<vmem>>, %arg4: memref<16x32xf32, #tpu.memory_space<vmem>>, %arg5: memref<16x1xf32, #tpu.memory_space<vmem>>, %arg6: memref<3x16xf32, #tpu.memory_space<vmem>>, %arg7: memref<3x1xf32, #tpu.memory_space<vmem>>, %arg8: memref<3x128xf32, #tpu.memory_space<vmem>>) attributes {dimension_semantics = [#tpu.dimension_semantics<parallel>], iteration_bounds = array<i64: 1>, scalar_prefetch = 0 : i64, scratch_operands = 0 : i64, tpu.core_type = #tpu.core_type<tc>, window_params = [{transform_indices = @transform_0, window_bounds = array<i64: 3, 128>}, {pipeline_mode = #tpu.pipeline_mode<synchronous>, transform_indices = @transform_1, window_bounds = array<i64: 32, 3>}, {pipeline_mode = #tpu.pipeline_mode<synchronous>, transform_indices = @transform_2, window_bounds = array<i64: 32, 1>}, {pipeline_mode = #tpu.pipeline_mode<synchronous>, transform_indices = @transform_3, window_bounds = array<i64: 16, 32>}, {pipeline_mode = #tpu.pipeline_mode<synchronous>, transform_indices = @transform_4, window_bounds = array<i64: 16, 1>}, {pipeline_mode = #tpu.pipeline_mode<synchronous>, transform_indices = @transform_5, window_bounds = array<i64: 3, 16>}, {pipeline_mode = #tpu.pipeline_mode<synchronous>, transform_indices = @transform_6, window_bounds = array<i64: 3, 1>}, {transform_indices = @transform_7, window_bounds = array<i64: 3, 128>}]} {
    %c0 = arith.constant 0 : index
    %c0_0 = arith.constant 0 : index
    %0 = vector.load %arg1[%c0, %c0_0] : memref<3x128xf32, #tpu.memory_space<vmem>>, vector<3x128xf32>
    %c0_1 = arith.constant 0 : index
    %c0_2 = arith.constant 0 : index
    %1 = vector.load %arg2[%c0_1, %c0_2] : memref<32x3xf32, #tpu.memory_space<vmem>>, vector<32x3xf32>
    %cst = arith.constant dense<0.000000e+00> : vector<32x128xf32>
    %2 = tpu.matmul %1, %0, %cst {dimension_numbers = #tpu.dot_dimension_numbers<[1], [0], [0], [1], [0, 0, 1, 1], [], []>} : vector<32x3xf32>, vector<3x128xf32>, vector<32x128xf32> -> vector<32x128xf32>
    %c0_3 = arith.constant 0 : index
    %c0_4 = arith.constant 0 : index
    %3 = vector.load %arg3[%c0_3, %c0_4] : memref<32x1xf32, #tpu.memory_space<vmem>>, vector<32x1xf32>
    %4 = vector.broadcast %3 : vector<32x1xf32> to vector<32x128xf32>
    %5 = arith.addf %2, %4 : vector<32x128xf32>
    %cst_5 = arith.constant 0.000000e+00 : f32
    %6 = vector.broadcast %cst_5 : f32 to vector<32x128xf32>
    %7 = arith.maximumf %5, %6 : vector<32x128xf32>
    %c0_6 = arith.constant 0 : index
    %c0_7 = arith.constant 0 : index
    %8 = vector.load %arg4[%c0_6, %c0_7] : memref<16x32xf32, #tpu.memory_space<vmem>>, vector<16x32xf32>
    %cst_8 = arith.constant dense<0.000000e+00> : vector<16x128xf32>
    %9 = tpu.matmul %8, %7, %cst_8 {dimension_numbers = #tpu.dot_dimension_numbers<[1], [0], [0], [1], [0, 0, 1, 1], [], []>} : vector<16x32xf32>, vector<32x128xf32>, vector<16x128xf32> -> vector<16x128xf32>
    %c0_9 = arith.constant 0 : index
    %c0_10 = arith.constant 0 : index
    %10 = vector.load %arg5[%c0_9, %c0_10] : memref<16x1xf32, #tpu.memory_space<vmem>>, vector<16x1xf32>
    %11 = vector.broadcast %10 : vector<16x1xf32> to vector<16x128xf32>
    %12 = arith.addf %9, %11 : vector<16x128xf32>
    %cst_11 = arith.constant 0.000000e+00 : f32
    %13 = vector.broadcast %cst_11 : f32 to vector<16x128xf32>
    %14 = arith.maximumf %12, %13 : vector<16x128xf32>
    %c0_12 = arith.constant 0 : index
    %c0_13 = arith.constant 0 : index
    %15 = vector.load %arg6[%c0_12, %c0_13] : memref<3x16xf32, #tpu.memory_space<vmem>>, vector<3x16xf32>
    %cst_14 = arith.constant dense<0.000000e+00> : vector<3x128xf32>
    %16 = tpu.matmul %15, %14, %cst_14 {dimension_numbers = #tpu.dot_dimension_numbers<[1], [0], [0], [1], [0, 0, 1, 1], [], []>} : vector<3x16xf32>, vector<16x128xf32>, vector<3x128xf32> -> vector<3x128xf32>
    %c0_15 = arith.constant 0 : index
    %c0_16 = arith.constant 0 : index
    %17 = vector.load %arg7[%c0_15, %c0_16] : memref<3x1xf32, #tpu.memory_space<vmem>>, vector<3x1xf32>
    %18 = vector.broadcast %17 : vector<3x1xf32> to vector<3x128xf32>
    %19 = arith.addf %16, %18 : vector<3x128xf32>
    %c0_17 = arith.constant 0 : index
    %c0_18 = arith.constant 0 : index
    %20 = vector.load %arg8[%c0_17, %c0_18] : memref<3x128xf32, #tpu.memory_space<vmem>>, vector<3x128xf32>
    tpu.vector_store %arg8[%c0_17, %c0_18], %19 {strides = array<i32>} : memref<3x128xf32, #tpu.memory_space<vmem>>, vector<3x128xf32>,
    return
  }
  func.func @transform_0(%arg0: i32) -> (i32, i32) {
    %c0_i32 = arith.constant 0 : i32
    %c0_i32_0 = arith.constant 0 : i32
    return %c0_i32, %arg0 : i32, i32
  }
  func.func @transform_1(%arg0: i32) -> (i32, i32) {
    %c0_i32 = arith.constant 0 : i32
    %c0_i32_0 = arith.constant 0 : i32
    %c0_i32_1 = arith.constant 0 : i32
    return %c0_i32, %c0_i32_0 : i32, i32
  }
  func.func @transform_2(%arg0: i32) -> (i32, i32) {
    %c0_i32 = arith.constant 0 : i32
    %c0_i32_0 = arith.constant 0 : i32
    %c0_i32_1 = arith.constant 0 : i32
    return %c0_i32, %c0_i32_0 : i32, i32
  }
  func.func @transform_3(%arg0: i32) -> (i32, i32) {
    %c0_i32 = arith.constant 0 : i32
    %c0_i32_0 = arith.constant 0 : i32
    %c0_i32_1 = arith.constant 0 : i32
    return %c0_i32, %c0_i32_0 : i32, i32
  }
  func.func @transform_4(%arg0: i32) -> (i32, i32) {
    %c0_i32 = arith.constant 0 : i32
    %c0_i32_0 = arith.constant 0 : i32
    %c0_i32_1 = arith.constant 0 : i32
    return %c0_i32, %c0_i32_0 : i32, i32
  }
  func.func @transform_5(%arg0: i32) -> (i32, i32) {
    %c0_i32 = arith.constant 0 : i32
    %c0_i32_0 = arith.constant 0 : i32
    %c0_i32_1 = arith.constant 0 : i32
    return %c0_i32, %c0_i32_0 : i32, i32
  }
  func.func @transform_6(%arg0: i32) -> (i32, i32) {
    %c0_i32 = arith.constant 0 : i32
    %c0_i32_0 = arith.constant 0 : i32
    %c0_i32_1 = arith.constant 0 : i32
    return %c0_i32, %c0_i32_0 : i32, i32
  }
  func.func @transform_7(%arg0: i32) -> (i32, i32) {
    %c0_i32 = arith.constant 0 : i32
    %c0_i32_0 = arith.constant 0 : i32
    return %c0_i32, %arg0 : i32, i32
  }
}

</mosaic_0001>

<bundles_post_ra>
// kernel: tpu_custom_call.1
= control target key start
LH: loop header
LB: loop body
LE: loop exit
PB: predicated region body
PF: predicated region fallthrough
CT: control target
= control target key end

     0   :  { %vm69_vm0 = vcmask 1042432   ;;  %vm56_vm1 = vcmask 23552   ;;  %v446_v5 = vmov 0   ;;  %s554_s0 = inlined_call_operand.vmem [shape: f32[3,128], index: 0, kind: input, shape index: {}]   ;;  %s555_s1 = inlined_call_operand.vmem [shape: f32[32,3], index: 1, kind: input, shape index: {}]   ;;  %s556_s2 = inlined_call_operand.vmem [shape: f32[32,1], index: 2, kind: input, shape index: {}]   ;;  %s557_s3 = inlined_call_operand.vmem [shape: f32[16,32], index: 3, kind: input, shape index: {}]   ;;  %s558_s4 = inlined_call_operand.vmem [shape: f32[16,1], index: 4, kind: input, shape index: {}]   ;;  %s559_s5 = inlined_call_operand.vmem [shape: f32[3,16], index: 5, kind: input, shape index: {}]   ;;  %s560_s6 = inlined_call_operand.vmem [shape: f32[3,1], index: 6, kind: input, shape index: {}]   ;;  %s561_s7 = inlined_call_operand.hbm [shape: f32[3,128], index: 7, kind: output, shape index: {}]  }
   0x1   :  { %v27_v0 = vld [vmem:[%s554_s0] sm:$0x7]  ;;  %v29_v2 = vld [vmem:[%s555_s1 + $0x8] sm:$0xff]  ;;  %v30_v3 = vld [vmem:[%s555_s1 + $0x10] sm:$0xff]  ;;  %420 = vset.pattern.permute.xlu0 %v446_v5  ;;  %421 = vset.pattern.permute.xlu1 %v446_v5 }
   0x2   :  { %v28_v1 = vld [vmem:[%s555_s1] sm:$0xff]  ;;  %378 = vmatprep.subr.msk.mxu0 %vm69_vm0, %v27_v0  ;;  %v34_v6 = vld [vmem:[%s556_s2 + $0x10] sm:$0xff]  ;;  %v31_v7 = vld [vmem:[%s555_s1 + $0x18] sm:$0xff] }
   0x3   :  { %380 = vmatprep.mubr.msk.f32.mxu0 %vm56_vm1, %v28_v1  ;;  %v32_v4 = vld [vmem:[%s556_s2] sm:$0xff]  ;;  %379 = vmatpush3.msk.msra.mxu0 %vm69_vm0, %v27_v0  ;;  %v33_v8 = vld [vmem:[%s556_s2 + $0x8] sm:$0xff] }
   0x4   :  { %381 = vmatmul.mubr.msk.f32.vlgmr.msra.gmra.mrb[0].mxu0 %vm56_vm1, %v29_v2  ;;  %38 = vperm.xlu0 %420, %v32_v4  }
   0x5   :  { %383 = vmatprep.mubr.msk.f32.mxu0 %vm56_vm1, %v30_v3 }
   0x6   :  { %12 = vsyncpa [#allocation3], 0  ;;  %48 = vperm.xlu1 %421, %v34_v6   ;;  %v35_v9 = vld [vmem:[%s556_s2 + $0x18] sm:$0xff]  ;;  %v164_v10 = vld [vmem:[%s558_s4] sm:$0xff]  ;;  %vm176_vm2 = vcmask 261120   ;;  %v447_v33 = vmov 0.0|0.0  }
   0x7   :  { %v165_v11 = vld [vmem:[%s558_s4 + $0x8] sm:$0xff]  ;;  %v261_v12 = vld [vmem:[%s560_s6] sm:$0x7]  ;;  %412 = vmatprep.subr.bf16.mxu0 %v447_v33  ;;  %vm448_vm3 = vmmov 0   ;;  %v449_v34 = vmov 0.0   ;;  %vm267_vm4 = vcmask 130048  }
   0x8   :  { %384 = vmatmul.mubr.msk.f32.gmra.mrb[2].mxu0 %vm56_vm1, %v31_v7  ;;  %43 = vperm.xlu0 %420, %v33_v8   ;;  %v162_v13 = vld [vmem:[%s557_s3] sm:$0xff]  ;;  %v163_v32 = vld [vmem:[%s557_s3 + $0x8] sm:$0xff]  ;;  %s450_s3 = smov [#allocation2]  }
   0x9   :  { %394 = vmatprep.mubr.msk.f32.mxu1 %vm176_vm2, %v162_v13  ;;  %401 = vmatprep.mubr.msk.f32.mxu0 %vm448_vm3, %v449_v34  ;;  %v260_v44 = vld [vmem:[%s559_s5] sm:$0x7]  ;;  %s348_s26 = sshll.u32 %s450_s3, 4  ;;  %s349_s26 = int_to_ptr.vmem [resolvable:$true] %s348_s26 }
   0xa   :  { %53 = vperm.xlu1 %421, %v35_v9   ;;  %s422_s27 = scalar_lea.vmem %s349_s26, 64  ;;  %p427_p1 = scmp.lt.s32.totalorder %s349_s26, %s349_s26 }
   0xb   :  { %p423_p0 = scmp.ne.s32.totalorder %s349_s26, %s422_s27  ;;  %p428_p2 = scmp.lt.s32.totalorder %s422_s27, %s422_s27 }
   0xc   :  { %168 = vperm.xlu0 %420, %v164_v10  }
   0xd   :  { %p429_p3 = por %p428_p2, %p427_p1 }
   0xe   :  { %173 = vperm.xlu1 %421, %v165_v11  }
   0xf   :  { %p430_p4 = pnand %p429_p3, %p423_p0 }
  0x10   :  { %264 = vperm.xlu0 %420, %v261_v12  }
  0x83   :  { %v39_v14 = vpop.permute.xlu0 %38 }
  0x85   :  { %v49_v15 = vpop.permute.xlu1 %48 }
  0x87   :  { %v44_v16 = vpop.permute.xlu0 %43 }
  0x89   :  { %v54_v22 = vpop.permute.xlu1 %53 }
  0x8b   :  { %v169_v37 = vpop.permute.xlu0 %168 }
  0x8d   :  { %v174_v35 = vpop.permute.xlu1 %173 }
  0x8f   :  { %v265_v45 = vpop.permute.xlu0 %264 }
  0xd7   :  { %v382_v17 = vpop.f32.mrb[0].mxu0 }
  0xd8   :  { %v145_v18 = vadd.f32 %v382_v17, %v44_v16  ;;  %v139_v19 = vpop.f32.mrb[1].mxu0 }
  0xd9   :  { %v140_v20 = vadd.f32 %v139_v19, %v39_v14 }
  0xda   :  { %v159_v21 = vmax.f32 %v145_v18, 0.0 }
  0xdb   :  { %v158_v23 = vmax.f32 %v140_v20, 0.0  ;;  %v385_v24 = vpop.f32.mrb[2].mxu0 }
  0xdc   :  { %v155_v25 = vadd.f32 %v385_v24, %v54_v22  ;;  %v149_v26 = vpop.f32.mrb[3].mxu0 }
  0xdd   :  { %v150_v27 = vadd.f32 %v149_v26, %v49_v15  ;;  %v404_v28 = vpack.c.bf16 %v159_v21, %v158_v23 }
  0xde   :  { %v161_v29 = vmax.f32 %v155_v25, 0.0 }
  0xdf   :  { %v160_v30 = vmax.f32 %v150_v27, 0.0  ;;  %405 = vmatprep.subr.bf16.mxu1 %v404_v28 }
  0xe0   :  { %407 = vmatpush3.bf16.msra.mxu1 %v404_v28 }
  0xe1   :  { %v408_v31 = vpack.c.bf16 %v161_v29, %v160_v30 }
  0xe3   :  { %409 = vmatprep.subr.bf16.mxu1 %v408_v31 }
  0xe4   :  { %411 = vmatpush3.bf16.msra.mxu1 %v408_v31 }
  0xe7   :  { %395 = vmatmul.mubr.msk.f32.vlgmr.msra.gmra.mrb[0].mxu1 %vm176_vm2, %v163_v32 }
 0x1ba   :  { %v396_v36 = vpop.f32.mrb[0].mxu1 }
 0x1bb   :  { %v255_v38 = vadd.f32 %v396_v36, %v174_v35  ;;  %v249_v39 = vpop.f32.mrb[1].mxu1 }
 0x1bc   :  { %v250_v40 = vadd.f32 %v249_v39, %v169_v37 }
 0x1bd   :  { %v259_v41 = vmax.f32 %v255_v38, 0.0 }
 0x1be   :  { %v258_v42 = vmax.f32 %v250_v40, 0.0 }
 0x1c0   :  { %v413_v43 = vpack.c.bf16 %v259_v41, %v258_v42 }
 0x1c2   :  { %414 = vmatpush3.bf16.msra.mxu0 %v413_v43 }
 0x1c5   :  { %402 = vmatmul.mubr.msk.f32.vlgmr.msra.gmra.mrb[4].mxu0 %vm267_vm4, %v260_v44 }
 0x298   :  { %v337_v46 = vpop.f32.mrb[4].mxu0 }
 0x299   :  { %v338_v47 = vadd.f32 %v337_v46, %v265_v45  ;;  %v403_v48 = vpop.f32.mrb[5].mxu0 }
 0x29b   :  { %341 = vst [vmem:[#allocation2] sm:$0x7] %v338_v47 }
 0x29c   :  { %433 = shalt.err (!%p430_p4)
}
 0x29d   :  { %s434_s5 = scalar_lea.hbm %s561_s7, 64 }
 0x29e   :  { %p435_p5 = scmp.ne.s32.totalorder %s561_s7, %s434_s5  ;;  %p438_p6 = scmp.lt.u32.totalorder %s434_s5, %s561_s7 }
 0x2a0   :  { %p440_p7 = pnand %p438_p6, %p435_p5 }
 0x2a2   :  { %443 = shalt.err (!%p440_p7)
}
 0x2a3   :  { %351 = dma.vmem_to_hbm [thread:$0]  %s349_s26, 64, %s561_s7, [#allocation3]  }
 0x2a4   :  { %444 = dma.done.wait [#allocation3], 64  }
 0x2a5   :  { %445 = vsyncadd [#allocation3], 4294967232 }
 0x2a6   :  { %355 = vsyncpa [#allocation3], 1 }

</bundles_post_ra>
